<compile_context>
chip_gen: v7x
topology: tpu7x:2x2x1
jax: 0.10.0
libtpu: 0.0.40
codegen_flags: <defaults>
</compile_context>

<pallas_src>
import functools

import jax
import jax.numpy as jnp
from jax import lax
from jax.experimental import pallas as pl
from jax.experimental.pallas import tpu as pltpu

_LANE = 128


def _cross_attention_kernel(p_ref, kv_ref, wt_ref, b_ref, gamma_ref, beta_ref,
                            o_ref, gram_ref, *, j_real, eps_eff, with_softmax,
                            exp_dtype):
    jp = gram_ref.shape[-1]

    # ---- Per-batch precompute (first I-tile only): G = k k^T ----------------
    #   k = v = k_v @ W^T + b. Padded rows of k are zeroed so the padded
    #   rows/cols of G -- and hence the padded columns of sim -- are exactly 0.
    @pl.when(pl.program_id(1) == 0)
    def _():
        k = jnp.dot(kv_ref[0], wt_ref[...],
                    preferred_element_type=jnp.float32)              # (Jp, D)
        k = k + b_ref[...].astype(jnp.float32)
        if j_real != jp:
            row = lax.broadcasted_iota(jnp.int32, k.shape, 0)
            k = jnp.where(row < j_real, k, 0.0)
        k = k.astype(gram_ref.dtype)
        g = lax.dot_general(k, k,
                            dimension_numbers=(((1,), (1,)), ((), ())),
                            preferred_element_type=jnp.float32)      # (Jp, Jp)
        gram_ref[...] = g.astype(gram_ref.dtype)

    # ---- sim = (p @ v) @ k^T == p @ (k k^T) == p @ G  (since v == k) --------
    # One canonical (TM,Jp)@(Jp,Jp) MXU matmul per tile, f32 accumulation.
    # The `* scale` factor is folded into eps_eff below.
    sim = jnp.dot(p_ref[0], gram_ref[...],
                  preferred_element_type=jnp.float32)                # (TM, Jp)

    # ---- LayerNorm over the real J columns (fused one-pass statistics) ------
    # Padded columns of sim are exactly zero, so plain row-sums are correct.
    inv_j = 1.0 / j_real
    mean = jnp.sum(sim, axis=-1, keepdims=True) * inv_j
    msq = jnp.sum(sim * sim, axis=-1, keepdims=True) * inv_j
    var = msq - mean * mean
    x = (sim - mean) * lax.rsqrt(var + eps_eff)
    # gamma/beta are zero-padded, so padded columns come out as exactly 0.
    x = x * gamma_ref[...].astype(jnp.float32) + beta_ref[...].astype(jnp.float32)

    # ---- Softmax over the real J columns (optional) --------------------------
    if with_softmax:
        if j_real != jp:
            col = lax.broadcasted_iota(jnp.int32, x.shape, 1)
            x = jnp.where(col < j_real, x, -jnp.inf)
        m = jnp.max(x, axis=-1, keepdims=True)
        e = jnp.exp((x - m).astype(exp_dtype)).astype(jnp.float32)
        x = e * pl.reciprocal(jnp.sum(e, axis=-1, keepdims=True), approx=True)

    # Dropout with drop_rate=0.0 is the identity.
    # TODO(synk): non-zero dropout would need pltpu.prng_seed/prng_random_bits.
    o_ref[0] = x.astype(o_ref.dtype)


def _vmem_capacity_bytes():
    try:
        return int(pltpu.get_tpu_info().vmem_capacity_bytes)
    except Exception:
        return 64 * 1024 * 1024          # conservative fallback (v7x per-TC)


def _supports_bf16_eup():
    """bf16 EUP/VPU path exists on v6e/v7x but not on v5e and older."""
    try:
        kind = jax.devices()[0].device_kind.lower()
    except Exception:
        return False
    return not any(v in kind for v in ("v2", "v3", "v4", "v5"))


def _pick_i_tile(I):
    """Whole-I tile when small; otherwise a 256/512 cap with a cdiv grid."""
    cap = 512 if _vmem_capacity_bytes() >= (96 << 20) else 256
    return I if I <= cap else cap


def _vmem_limit_bytes(TM, Jp, D, itemsize, single_buffered_invariants):
    inv = 1 if single_buffered_invariants else 2
    need = 0
    need += 2 * TM * Jp * itemsize                  # p blocks (double-buffered)
    need += 2 * TM * Jp * itemsize                  # output blocks
    need += 2 * Jp * D * itemsize                   # k_v blocks
    need += inv * (D * D + D + 2 * Jp) * itemsize   # W^T / bias / gamma / beta
    need += Jp * Jp * itemsize                      # gram scratch
    need += (Jp * D + Jp * Jp + 2 * TM * Jp) * 4    # f32 temporaries (k, G, sim)
    need = int(need * 1.25) + (2 << 20)
    cap = int(0.75 * _vmem_capacity_bytes())
    return max(4 << 20, min(need, cap))


def cross_attention(p, k_v, w, b, gamma, beta, *, scale, eps=1e-6,
                    with_softmax=True):
    """p: (B, I, J), k_v: (B, J, D), w: (D, D) torch Linear weight (out, in),
    b: (D,), gamma/beta: (J,). Returns (B, I, J)."""
    B, I, J = p.shape
    _, Jk, D = k_v.shape
    assert Jk == J, "k_v sequence length must equal image_dims J"

    # Lane-dense output: pad J to a multiple of 128. LN / softmax statistics
    # mask the padded columns inside the kernel, so this is exact.
    Jp = ((J + _LANE - 1) // _LANE) * _LANE
    if Jp != J:
        p = jnp.pad(p, ((0, 0), (0, 0), (0, Jp - J)))
        k_v = jnp.pad(k_v, ((0, 0), (0, Jp - J), (0, 0)))
        gamma = jnp.pad(gamma, (0, Jp - J))
        beta = jnp.pad(beta, (0, Jp - J))

    TM = _pick_i_tile(I)
    n_i = pl.cdiv(I, TM)

    wt = jnp.asarray(w).T              # pre-transpose once: kv @ w.T == kv @ wt
    b2 = b.reshape(1, D)
    gamma2 = gamma.reshape(1, Jp)
    beta2 = beta.reshape(1, Jp)

    # Fold `* scale` into the LayerNorm:  LN_eps(scale*x) == LN_{eps/scale^2}(x)
    eps_eff = float(eps) / (float(scale) ** 2)

    # bf16 exp only for bf16 activations on chips with a bf16 EUP (v6e/v7x);
    # v5e and older keep the f32 epilogue (no bf16 VPU/EUP path there).
    exp_dtype = (jnp.bfloat16
                 if (p.dtype == jnp.bfloat16 and _supports_bf16_eup())
                 else jnp.float32)

    kernel = functools.partial(
        _cross_attention_kernel, j_real=J, eps_eff=eps_eff,
        with_softmax=with_softmax, exp_dtype=exp_dtype)

    out_shape = jax.ShapeDtypeStruct((B, I, Jp), p.dtype)
    itemsize = jnp.dtype(p.dtype).itemsize

    def build(single_buffered_invariants):
        # Loop-invariant operands need only a single VMEM buffer.
        inv_kw = ({"pipeline_mode": pl.Buffered(1)}
                  if single_buffered_invariants else {})
        grid_spec = pltpu.PrefetchScalarGridSpec(
            num_scalar_prefetch=0,
            grid=(B, n_i),
            in_specs=[
                pl.BlockSpec((1, TM, Jp), lambda bb, ii: (bb, ii, 0)),       # p
                pl.BlockSpec((1, Jp, D), lambda bb, ii: (bb, 0, 0)),         # k_v
                pl.BlockSpec((D, D), lambda bb, ii: (0, 0), **inv_kw),       # W^T
                pl.BlockSpec((1, D), lambda bb, ii: (0, 0), **inv_kw),       # bias
                pl.BlockSpec((1, Jp), lambda bb, ii: (0, 0), **inv_kw),      # gamma
                pl.BlockSpec((1, Jp), lambda bb, ii: (0, 0), **inv_kw),      # beta
            ],
            out_specs=pl.BlockSpec((1, TM, Jp), lambda bb, ii: (bb, ii, 0)),
            scratch_shapes=[pltpu.VMEM((Jp, Jp), p.dtype)],                  # G
        )
        return pl.pallas_call(
            kernel,
            out_shape=out_shape,
            grid_spec=grid_spec,
            compiler_params=pltpu.CompilerParams(
                # Only the B axis is megacore-parallel; for B == 1 on a 2-TC
                # chip (v7x), split I into an outer parallel axis instead.
                dimension_semantics=("parallel", "arbitrary"),
                vmem_limit_bytes=_vmem_limit_bytes(
                    TM, Jp, D, itemsize, single_buffered_invariants)))

    try:
        out = build(True)(p, k_v, wt, b2, gamma2, beta2)
    except Exception:
        # pipeline_mode=pl.Buffered(1) not supported by this jax version:
        # fall back to default double-buffered invariant operands.
        out = build(False)(p, k_v, wt, b2, gamma2, beta2)

    return out[:, :, :J] if Jp != J else out


def _reference(p, k_v, w, b, gamma, beta, *, scale, eps=1e-6,
               with_softmax=True):
    k = jnp.einsum('bjd,ed->bje', k_v, w) + b
    v = k
    out = jnp.einsum('bij,bjd->bid', p, v)
    sim = jnp.einsum('bid,bjd->bij', out, k) * scale
    mean = sim.mean(-1, keepdims=True)
    var = ((sim - mean) ** 2).mean(-1, keepdims=True)
    sim = (sim - mean) / jnp.sqrt(var + eps) * gamma + beta
    if with_softmax:
        return jax.nn.softmax(sim, axis=-1)
    return sim


if __name__ == "__main__":
    B = 2          # batch
    I = 8          # query sequence length
    J = 16         # image_dims (k_v sequence length, LN normalized dim)
    D = 32         # embed_dims

    scale = float(J) ** (-0.5)

    key = jax.random.PRNGKey(0)
    kp, kk, kw, kb, kg, kbt = jax.random.split(key, 6)

    p = jax.random.normal(kp, (B, I, J), dtype=jnp.float32)
    k_v = jax.random.normal(kk, (B, J, D), dtype=jnp.float32)

    # Deterministic parameter init (to_k Linear and LayerNorm affine).
    w = jax.random.normal(kw, (D, D), dtype=jnp.float32) * (D ** -0.5)
    b = jax.random.normal(kb, (D,), dtype=jnp.float32) * 0.02
    gamma = 1.0 + 0.1 * jax.random.normal(kg, (J,), dtype=jnp.float32)
    beta = 0.05 * jax.random.normal(kbt, (J,), dtype=jnp.float32)

    # No-softmax path: all-f32 pipeline, tight tolerance.
    sim = jax.block_until_ready(
        cross_attention(p, k_v, w, b, gamma, beta, scale=scale,
                        with_softmax=False))
    sim_ref = _reference(p, k_v, w, b, gamma, beta, scale=scale,
                         with_softmax=False)
    assert sim.shape == (B, I, J)
    assert jnp.allclose(sim, sim_ref, atol=1e-3, rtol=1e-3), (
        "mismatch vs reference (no softmax): "
        f"{jnp.max(jnp.abs(sim - sim_ref))}")

    # Softmax path: tolerance loosened for pl.reciprocal(approx=True).
    attn = jax.block_until_ready(
        cross_attention(p, k_v, w, b, gamma, beta, scale=scale,
                        with_softmax=True))
    ref = _reference(p, k_v, w, b, gamma, beta, scale=scale, with_softmax=True)
    assert attn.shape == (B, I, J)
    assert jnp.allclose(attn, ref, atol=1e-2, rtol=1e-2), (
        "mismatch vs reference (softmax): "
        f"{jnp.max(jnp.abs(attn - ref))}")

    print("KERNEL_OK")
</pallas_src>

<mosaic_0001>
module attributes {stable_mosaic.version = 11 : i64} {
  func.func @_cross_attention_kernel(%arg0: i32, %arg1: i32, %arg2: memref<1x8x128xf32, #tpu.memory_space<vmem>>, %arg3: memref<1x128x32xf32, #tpu.memory_space<vmem>>, %arg4: memref<32x32xf32, #tpu.memory_space<vmem>>, %arg5: memref<1x32xf32, #tpu.memory_space<vmem>>, %arg6: memref<1x128xf32, #tpu.memory_space<vmem>>, %arg7: memref<1x128xf32, #tpu.memory_space<vmem>>, %arg8: memref<1x8x128xf32, #tpu.memory_space<vmem>>, %arg9: memref<128x128xf32, #tpu.memory_space<vmem>>) attributes {dimension_semantics = [#tpu.dimension_semantics<parallel>, #tpu.dimension_semantics<arbitrary>], iteration_bounds = array<i64: 2, 1>, scalar_prefetch = 0 : i64, scratch_operands = 1 : i64, tpu.core_type = #tpu.core_type<tc>, window_params = [{transform_indices = @transform_0, window_bounds = array<i64: 1, 8, 128>}, {transform_indices = @transform_1, window_bounds = array<i64: 1, 128, 32>}, {pipeline_mode = #tpu.pipeline_mode<synchronous>, transform_indices = @transform_2, window_bounds = array<i64: 32, 32>}, {pipeline_mode = #tpu.pipeline_mode<synchronous>, transform_indices = @transform_3, window_bounds = array<i64: 1, 32>}, {pipeline_mode = #tpu.pipeline_mode<synchronous>, transform_indices = @transform_4, window_bounds = array<i64: 1, 128>}, {pipeline_mode = #tpu.pipeline_mode<synchronous>, transform_indices = @transform_5, window_bounds = array<i64: 1, 128>}, {transform_indices = @transform_6, window_bounds = array<i64: 1, 8, 128>}]} {
    %c0_i32 = arith.constant 0 : i32
    %0 = arith.cmpi eq, %arg1, %c0_i32 : i32
    %1 = arith.extui %0 : i1 to i32
    %c0_i32_0 = arith.constant 0 : i32
    %2 = arith.cmpi ne, %1, %c0_i32_0 : i32
    scf.if %2 {
      %c0_17 = arith.constant 0 : index
      %c0_18 = arith.constant 0 : index
      %c0_19 = arith.constant 0 : index
      %34 = vector.load %arg3[%c0_17, %c0_18, %c0_19] : memref<1x128x32xf32, #tpu.memory_space<vmem>>, vector<1x128x32xf32>
      %35 = vector.shape_cast %34 : vector<1x128x32xf32> to vector<128x32xf32>
      %c0_20 = arith.constant 0 : index
      %c0_21 = arith.constant 0 : index
      %36 = vector.load %arg4[%c0_20, %c0_21] : memref<32x32xf32, #tpu.memory_space<vmem>>, vector<32x32xf32>
      %cst_22 = arith.constant dense<0.000000e+00> : vector<128x32xf32>
      %37 = tpu.matmul %35, %36, %cst_22 {dimension_numbers = #tpu.dot_dimension_numbers<[1], [0], [0], [1], [0, 0, 1, 1], [], []>} : vector<128x32xf32>, vector<32x32xf32>, vector<128x32xf32> -> vector<128x32xf32>
      %c0_23 = arith.constant 0 : index
      %c0_24 = arith.constant 0 : index
      %38 = vector.load %arg5[%c0_23, %c0_24] : memref<1x32xf32, #tpu.memory_space<vmem>>, vector<1x32xf32>
      %39 = vector.broadcast %38 : vector<1x32xf32> to vector<128x32xf32>
      %40 = arith.addf %37, %39 : vector<128x32xf32>
      %41 = tpu.iota {dimensions = array<i32: 0>} : vector<128x32xi32>
      %c16_i32 = arith.constant 16 : i32
      %42 = vector.broadcast %c16_i32 : i32 to vector<128x32xi32>
      %43 = arith.cmpi slt, %41, %42 : vector<128x32xi32>
      %cst_25 = arith.constant 0.000000e+00 : f32
      %44 = vector.broadcast %cst_25 : f32 to vector<128x32xf32>
      %45 = arith.select %43, %40, %44 : vector<128x32xi1>, vector<128x32xf32>
      %cst_26 = arith.constant dense<0.000000e+00> : vector<128x128xf32>
      %46 = tpu.matmul %45, %45, %cst_26 {dimension_numbers = #tpu.dot_dimension_numbers<[1], [1], [0], [0], [0, 0, 1, 0], [], []>} : vector<128x32xf32>, vector<128x32xf32>, vector<128x128xf32> -> vector<128x128xf32>
      %c0_27 = arith.constant 0 : index
      %c0_28 = arith.constant 0 : index
      %47 = vector.load %arg9[%c0_27, %c0_28] : memref<128x128xf32, #tpu.memory_space<vmem>>, vector<128x128xf32>
      tpu.vector_store %arg9[%c0_27, %c0_28], %46 {strides = array<i32>} : memref<128x128xf32, #tpu.memory_space<vmem>>, vector<128x128xf32>,
    } else {
    }
    %c0 = arith.constant 0 : index
    %c0_1 = arith.constant 0 : index
    %c0_2 = arith.constant 0 : index
    %3 = vector.load %arg2[%c0, %c0_1, %c0_2] : memref<1x8x128xf32, #tpu.memory_space<vmem>>, vector<1x8x128xf32>
    %4 = vector.shape_cast %3 : vector<1x8x128xf32> to vector<8x128xf32>
    %c0_3 = arith.constant 0 : index
    %c0_4 = arith.constant 0 : index
    %5 = vector.load %arg9[%c0_3, %c0_4] : memref<128x128xf32, #tpu.memory_space<vmem>>, vector<128x128xf32>
    %cst = arith.constant dense<0.000000e+00> : vector<8x128xf32>
    %6 = tpu.matmul %4, %5, %cst {dimension_numbers = #tpu.dot_dimension_numbers<[1], [0], [0], [1], [0, 0, 1, 1], [], []>} : vector<8x128xf32>, vector<128x128xf32>, vector<8x128xf32> -> vector<8x128xf32>
    %cst_5 = arith.constant dense<0.000000e+00> : vector<8xf32>
    %7 = vector.multi_reduction <add>, %6, %cst_5 [1] : vector<8x128xf32> to vector<8xf32>
    %8 = vector.shape_cast %7 : vector<8xf32> to vector<8x1xf32>
    %cst_6 = arith.constant 6.250000e-02 : f32
    %9 = vector.broadcast %cst_6 : f32 to vector<8x1xf32>
    %10 = arith.mulf %8, %9 : vector<8x1xf32>
    %11 = arith.mulf %6, %6 : vector<8x128xf32>
    %cst_7 = arith.constant dense<0.000000e+00> : vector<8xf32>
    %12 = vector.multi_reduction <add>, %11, %cst_7 [1] : vector<8x128xf32> to vector<8xf32>
    %13 = vector.shape_cast %12 : vector<8xf32> to vector<8x1xf32>
    %cst_8 = arith.constant 6.250000e-02 : f32
    %14 = vector.broadcast %cst_8 : f32 to vector<8x1xf32>
    %15 = arith.mulf %13, %14 : vector<8x1xf32>
    %16 = arith.mulf %10, %10 : vector<8x1xf32>
    %17 = arith.subf %15, %16 : vector<8x1xf32>
    %18 = vector.broadcast %10 : vector<8x1xf32> to vector<8x128xf32>
    %19 = arith.subf %6, %18 : vector<8x128xf32>
    %cst_9 = arith.constant 1.600000e-05 : f32
    %20 = vector.broadcast %cst_9 : f32 to vector<8x1xf32>
    %21 = arith.addf %17, %20 : vector<8x1xf32>
    %22 = math.rsqrt %21 : vector<8x1xf32>
    %23 = vector.broadcast %22 : vector<8x1xf32> to vector<8x128xf32>
    %24 = arith.mulf %19, %23 : vector<8x128xf32>
    %c0_10 = arith.constant 0 : index
    %c0_11 = arith.constant 0 : index
    %25 = vector.load %arg6[%c0_10, %c0_11] : memref<1x128xf32, #tpu.memory_space<vmem>>, vector<1x128xf32>
    %26 = vector.broadcast %25 : vector<1x128xf32> to vector<8x128xf32>
    %27 = arith.mulf %24, %26 : vector<8x128xf32>
    %c0_12 = arith.constant 0 : index
    %c0_13 = arith.constant 0 : index
    %28 = vector.load %arg7[%c0_12, %c0_13] : memref<1x128xf32, #tpu.memory_space<vmem>>, vector<1x128xf32>
    %29 = vector.broadcast %28 : vector<1x128xf32> to vector<8x128xf32>
    %30 = arith.addf %27, %29 : vector<8x128xf32>
    %c0_14 = arith.constant 0 : index
    %c0_15 = arith.constant 0 : index
    %c0_16 = arith.constant 0 : index
    %31 = vector.load %arg8[%c0_14, %c0_15, %c0_16] : memref<1x8x128xf32, #tpu.memory_space<vmem>>, vector<1x8x128xf32>
    %32 = vector.shape_cast %31 : vector<1x8x128xf32> to vector<8x128xf32>
    %33 = vector.shape_cast %30 : vector<8x128xf32> to vector<1x8x128xf32>
    tpu.vector_store %arg8[%c0_14, %c0_15, %c0_16], %33 {strides = array<i32>} : memref<1x8x128xf32, #tpu.memory_space<vmem>>, vector<1x8x128xf32>,
    return
  }
  func.func @transform_0(%arg0: i32, %arg1: i32) -> (i32, i32, i32) {
    %c0_i32 = arith.constant 0 : i32
    %c0_i32_0 = arith.constant 0 : i32
    return %arg0, %arg1, %c0_i32 : i32, i32, i32
  }
  func.func @transform_1(%arg0: i32, %arg1: i32) -> (i32, i32, i32) {
    %c0_i32 = arith.constant 0 : i32
    %c0_i32_0 = arith.constant 0 : i32
    %c0_i32_1 = arith.constant 0 : i32
    return %arg0, %c0_i32, %c0_i32_0 : i32, i32, i32
  }
  func.func @transform_2(%arg0: i32, %arg1: i32) -> (i32, i32) {
    %c0_i32 = arith.constant 0 : i32
    %c0_i32_0 = arith.constant 0 : i32
    %c0_i32_1 = arith.constant 0 : i32
    return %c0_i32, %c0_i32_0 : i32, i32
  }
  func.func @transform_3(%arg0: i32, %arg1: i32) -> (i32, i32) {
    %c0_i32 = arith.constant 0 : i32
    %c0_i32_0 = arith.constant 0 : i32
    %c0_i32_1 = arith.constant 0 : i32
    return %c0_i32, %c0_i32_0 : i32, i32
  }
  func.func @transform_4(%arg0: i32, %arg1: i32) -> (i32, i32) {
    %c0_i32 = arith.constant 0 : i32
    %c0_i32_0 = arith.constant 0 : i32
    %c0_i32_1 = arith.constant 0 : i32
    return %c0_i32, %c0_i32_0 : i32, i32
  }
  func.func @transform_5(%arg0: i32, %arg1: i32) -> (i32, i32) {
    %c0_i32 = arith.constant 0 : i32
    %c0_i32_0 = arith.constant 0 : i32
    %c0_i32_1 = arith.constant 0 : i32
    return %c0_i32, %c0_i32_0 : i32, i32
  }
  func.func @transform_6(%arg0: i32, %arg1: i32) -> (i32, i32, i32) {
    %c0_i32 = arith.constant 0 : i32
    %c0_i32_0 = arith.constant 0 : i32
    return %arg0, %arg1, %c0_i32 : i32, i32, i32
  }
}

module attributes {stable_mosaic.version = 11 : i64} {
  func.func @_cross_attention_kernel(%arg0: i32, %arg1: i32, %arg2: memref<1x8x128xf32, #tpu.memory_space<vmem>>, %arg3: memref<1x128x32xf32, #tpu.memory_space<vmem>>, %arg4: memref<32x32xf32, #tpu.memory_space<vmem>>, %arg5: memref<1x32xf32, #tpu.memory_space<vmem>>, %arg6: memref<1x128xf32, #tpu.memory_space<vmem>>, %arg7: memref<1x128xf32, #tpu.memory_space<vmem>>, %arg8: memref<1x8x128xf32, #tpu.memory_space<vmem>>, %arg9: memref<128x128xf32, #tpu.memory_space<vmem>>) attributes {dimension_semantics = [#tpu.dimension_semantics<parallel>, #tpu.dimension_semantics<arbitrary>], iteration_bounds = array<i64: 2, 1>, scalar_prefetch = 0 : i64, scratch_operands = 1 : i64, tpu.core_type = #tpu.core_type<tc>, window_params = [{transform_indices = @transform_0, window_bounds = array<i64: 1, 8, 128>}, {transform_indices = @transform_1, window_bounds = array<i64: 1, 128, 32>}, {pipeline_mode = #tpu.pipeline_mode<synchronous>, transform_indices = @transform_2, window_bounds = array<i64: 32, 32>}, {pipeline_mode = #tpu.pipeline_mode<synchronous>, transform_indices = @transform_3, window_bounds = array<i64: 1, 32>}, {pipeline_mode = #tpu.pipeline_mode<synchronous>, transform_indices = @transform_4, window_bounds = array<i64: 1, 128>}, {pipeline_mode = #tpu.pipeline_mode<synchronous>, transform_indices = @transform_5, window_bounds = array<i64: 1, 128>}, {transform_indices = @transform_6, window_bounds = array<i64: 1, 8, 128>}]} {
    %c0_i32 = arith.constant 0 : i32
    %0 = arith.cmpi eq, %arg1, %c0_i32 : i32
    %1 = arith.extui %0 : i1 to i32
    %c0_i32_0 = arith.constant 0 : i32
    %2 = arith.cmpi ne, %1, %c0_i32_0 : i32
    scf.if %2 {
      %c0_17 = arith.constant 0 : index
      %c0_18 = arith.constant 0 : index
      %c0_19 = arith.constant 0 : index
      %34 = vector.load %arg3[%c0_17, %c0_18, %c0_19] : memref<1x128x32xf32, #tpu.memory_space<vmem>>, vector<1x128x32xf32>
      %35 = vector.shape_cast %34 : vector<1x128x32xf32> to vector<128x32xf32>
      %c0_20 = arith.constant 0 : index
      %c0_21 = arith.constant 0 : index
      %36 = vector.load %arg4[%c0_20, %c0_21] : memref<32x32xf32, #tpu.memory_space<vmem>>, vector<32x32xf32>
      %cst_22 = arith.constant dense<0.000000e+00> : vector<128x32xf32>
      %37 = tpu.matmul %35, %36, %cst_22 {dimension_numbers = #tpu.dot_dimension_numbers<[1], [0], [0], [1], [0, 0, 1, 1], [], []>} : vector<128x32xf32>, vector<32x32xf32>, vector<128x32xf32> -> vector<128x32xf32>
      %c0_23 = arith.constant 0 : index
      %c0_24 = arith.constant 0 : index
      %38 = vector.load %arg5[%c0_23, %c0_24] : memref<1x32xf32, #tpu.memory_space<vmem>>, vector<1x32xf32>
      %39 = vector.broadcast %38 : vector<1x32xf32> to vector<128x32xf32>
      %40 = arith.addf %37, %39 : vector<128x32xf32>
      %41 = tpu.iota {dimensions = array<i32: 0>} : vector<128x32xi32>
      %c16_i32 = arith.constant 16 : i32
      %42 = vector.broadcast %c16_i32 : i32 to vector<128x32xi32>
      %43 = arith.cmpi slt, %41, %42 : vector<128x32xi32>
      %cst_25 = arith.constant 0.000000e+00 : f32
      %44 = vector.broadcast %cst_25 : f32 to vector<128x32xf32>
      %45 = arith.select %43, %40, %44 : vector<128x32xi1>, vector<128x32xf32>
      %cst_26 = arith.constant dense<0.000000e+00> : vector<128x128xf32>
      %46 = tpu.matmul %45, %45, %cst_26 {dimension_numbers = #tpu.dot_dimension_numbers<[1], [1], [0], [0], [0, 0, 1, 0], [], []>} : vector<128x32xf32>, vector<128x32xf32>, vector<128x128xf32> -> vector<128x128xf32>
      %c0_27 = arith.constant 0 : index
      %c0_28 = arith.constant 0 : index
      %47 = vector.load %arg9[%c0_27, %c0_28] : memref<128x128xf32, #tpu.memory_space<vmem>>, vector<128x128xf32>
      tpu.vector_store %arg9[%c0_27, %c0_28], %46 {strides = array<i32>} : memref<128x128xf32, #tpu.memory_space<vmem>>, vector<128x128xf32>,
    } else {
    }
    %c0 = arith.constant 0 : index
    %c0_1 = arith.constant 0 : index
    %c0_2 = arith.constant 0 : index
    %3 = vector.load %arg2[%c0, %c0_1, %c0_2] : memref<1x8x128xf32, #tpu.memory_space<vmem>>, vector<1x8x128xf32>
    %4 = vector.shape_cast %3 : vector<1x8x128xf32> to vector<8x128xf32>
    %c0_3 = arith.constant 0 : index
    %c0_4 = arith.constant 0 : index
    %5 = vector.load %arg9[%c0_3, %c0_4] : memref<128x128xf32, #tpu.memory_space<vmem>>, vector<128x128xf32>
    %cst = arith.constant dense<0.000000e+00> : vector<8x128xf32>
    %6 = tpu.matmul %4, %5, %cst {dimension_numbers = #tpu.dot_dimension_numbers<[1], [0], [0], [1], [0, 0, 1, 1], [], []>} : vector<8x128xf32>, vector<128x128xf32>, vector<8x128xf32> -> vector<8x128xf32>
    %cst_5 = arith.constant dense<0.000000e+00> : vector<8xf32>
    %7 = vector.multi_reduction <add>, %6, %cst_5 [1] : vector<8x128xf32> to vector<8xf32>
    %8 = vector.shape_cast %7 : vector<8xf32> to vector<8x1xf32>
    %cst_6 = arith.constant 6.250000e-02 : f32
    %9 = vector.broadcast %cst_6 : f32 to vector<8x1xf32>
    %10 = arith.mulf %8, %9 : vector<8x1xf32>
    %11 = arith.mulf %6, %6 : vector<8x128xf32>
    %cst_7 = arith.constant dense<0.000000e+00> : vector<8xf32>
    %12 = vector.multi_reduction <add>, %11, %cst_7 [1] : vector<8x128xf32> to vector<8xf32>
    %13 = vector.shape_cast %12 : vector<8xf32> to vector<8x1xf32>
    %cst_8 = arith.constant 6.250000e-02 : f32
    %14 = vector.broadcast %cst_8 : f32 to vector<8x1xf32>
    %15 = arith.mulf %13, %14 : vector<8x1xf32>
    %16 = arith.mulf %10, %10 : vector<8x1xf32>
    %17 = arith.subf %15, %16 : vector<8x1xf32>
    %18 = vector.broadcast %10 : vector<8x1xf32> to vector<8x128xf32>
    %19 = arith.subf %6, %18 : vector<8x128xf32>
    %cst_9 = arith.constant 1.600000e-05 : f32
    %20 = vector.broadcast %cst_9 : f32 to vector<8x1xf32>
    %21 = arith.addf %17, %20 : vector<8x1xf32>
    %22 = math.rsqrt %21 : vector<8x1xf32>
    %23 = vector.broadcast %22 : vector<8x1xf32> to vector<8x128xf32>
    %24 = arith.mulf %19, %23 : vector<8x128xf32>
    %c0_10 = arith.constant 0 : index
    %c0_11 = arith.constant 0 : index
    %25 = vector.load %arg6[%c0_10, %c0_11] : memref<1x128xf32, #tpu.memory_space<vmem>>, vector<1x128xf32>
    %26 = vector.broadcast %25 : vector<1x128xf32> to vector<8x128xf32>
    %27 = arith.mulf %24, %26 : vector<8x128xf32>
    %c0_12 = arith.constant 0 : index
    %c0_13 = arith.constant 0 : index
    %28 = vector.load %arg7[%c0_12, %c0_13] : memref<1x128xf32, #tpu.memory_space<vmem>>, vector<1x128xf32>
    %29 = vector.broadcast %28 : vector<1x128xf32> to vector<8x128xf32>
    %30 = arith.addf %27, %29 : vector<8x128xf32>
    %c0_14 = arith.constant 0 : index
    %c0_15 = arith.constant 0 : index
    %c0_16 = arith.constant 0 : index
    %31 = vector.load %arg8[%c0_14, %c0_15, %c0_16] : memref<1x8x128xf32, #tpu.memory_space<vmem>>, vector<1x8x128xf32>
    %32 = vector.shape_cast %31 : vector<1x8x128xf32> to vector<8x128xf32>
    %33 = vector.shape_cast %30 : vector<8x128xf32> to vector<1x8x128xf32>
    tpu.vector_store %arg8[%c0_14, %c0_15, %c0_16], %33 {strides = array<i32>} : memref<1x8x128xf32, #tpu.memory_space<vmem>>, vector<1x8x128xf32>,
    return
  }
  func.func @transform_0(%arg0: i32, %arg1: i32) -> (i32, i32, i32) {
    %c0_i32 = arith.constant 0 : i32
    %c0_i32_0 = arith.constant 0 : i32
    return %arg0, %arg1, %c0_i32 : i32, i32, i32
  }
  func.func @transform_1(%arg0: i32, %arg1: i32) -> (i32, i32, i32) {
    %c0_i32 = arith.constant 0 : i32
    %c0_i32_0 = arith.constant 0 : i32
    %c0_i32_1 = arith.constant 0 : i32
    return %arg0, %c0_i32, %c0_i32_0 : i32, i32, i32
  }
  func.func @transform_2(%arg0: i32, %arg1: i32) -> (i32, i32) {
    %c0_i32 = arith.constant 0 : i32
    %c0_i32_0 = arith.constant 0 : i32
    %c0_i32_1 = arith.constant 0 : i32
    return %c0_i32, %c0_i32_0 : i32, i32
  }
  func.func @transform_3(%arg0: i32, %arg1: i32) -> (i32, i32) {
    %c0_i32 = arith.constant 0 : i32
    %c0_i32_0 = arith.constant 0 : i32
    %c0_i32_1 = arith.constant 0 : i32
    return %c0_i32, %c0_i32_0 : i32, i32
  }
  func.func @transform_4(%arg0: i32, %arg1: i32) -> (i32, i32) {
    %c0_i32 = arith.constant 0 : i32
    %c0_i32_0 = arith.constant 0 : i32
    %c0_i32_1 = arith.constant 0 : i32
    return %c0_i32, %c0_i32_0 : i32, i32
  }
  func.func @transform_5(%arg0: i32, %arg1: i32) -> (i32, i32) {
    %c0_i32 = arith.constant 0 : i32
    %c0_i32_0 = arith.constant 0 : i32
    %c0_i32_1 = arith.constant 0 : i32
    return %c0_i32, %c0_i32_0 : i32, i32
  }
  func.func @transform_6(%arg0: i32, %arg1: i32) -> (i32, i32, i32) {
    %c0_i32 = arith.constant 0 : i32
    %c0_i32_0 = arith.constant 0 : i32
    return %arg0, %arg1, %c0_i32 : i32, i32, i32
  }
}

</mosaic_0001>

<bundles_post_ra>
// kernel: tpu_custom_call.1
= control target key start
LH: loop header
LB: loop body
LE: loop exit
PB: predicated region body
PF: predicated region fallthrough
CT: control target
= control target key end

     0   :  { %11 = vsyncpa [#allocation4], 0  ;;  %s1580_s0 = inlined_call_operand.vmem [shape: f32[2,8,128], index: 0, kind: input, shape index: {}]   ;;  %s1581_s1 = inlined_call_operand.vmem [shape: f32[2,128,32], index: 1, kind: input, shape index: {}]   ;;  %s1582_s2 = inlined_call_operand.vmem [shape: f32[32,32], index: 2, kind: input, shape index: {}]   ;;  %s1583_s3 = inlined_call_operand.vmem [shape: f32[1,32], index: 3, kind: input, shape index: {}]   ;;  %s1584_s4 = inlined_call_operand.vmem [shape: f32[1,128], index: 4, kind: input, shape index: {}]   ;;  %s1585_s5 = inlined_call_operand.vmem [shape: f32[1,128], index: 5, kind: input, shape index: {}]   ;;  %s1586_s6 = inlined_call_operand.hbm [shape: f32[2,8,128], index: 6, kind: output, shape index: {}]  }
   0x1   :  { %13 = vsyncpa [#allocation4 + $0x1], 0  ;;  %s1394_s21 = smov 0   ;;  %s1396_s22 = smov 0  }
   0x2   :  { %s1398_s23 = smov 0   ;;  %s1400_s24 = smov 0  }
   0x3   :  { %s1402_s25 = smov 0   ;;  %s1404_s26 = smov 0  }
   0x4 LB: > { %s990_s27 = sadd.s32 4294967295, %s1353_s26   ;;  %s991_s28 = sadd.s32 4294967294, %s1353_s26   ;;  %s1353_s26 = sphi %s1404_s26, %s19_s26   ;;  %s1349_s25 = sphi %s1402_s25, %s1593_s25   ;;  %s1345_s24 = sphi %s1400_s24, %s1592_s24   ;;  %s1341_s23 = sphi %s1398_s23, %s1591_s23   ;;  %s1337_s22 = sphi %s1396_s22, %s1590_s22   ;;  %s1333_s21 = sphi %s1394_s21, %s1589_s21  }
   0x5   : > { %s31_s29 = sadd.s32 1, %s1349_s25  ;;  %s178_s30 = sadd.s32 1, %s1341_s23 }
   0x6   : > { %p33_p0 = scmp.ge.s32.totalorder %s31_s29, 2  ;;  %p188_p1 = scmp.ne.s32.totalorder %s1341_s23, %s1337_s22 }
   0x7   : > { %p189_p2 = scmp.eq.s32.totalorder %s990_s27, 1  ;;  %p194_p3 = scmp.ne.s32.totalorder %s1337_s22, %s1333_s21 }
   0x8   : > { %s1595_s29 = smov (%p33_p0, %s31_s29), 0  ;;  %p195_p5 = scmp.eq.s32.totalorder %s991_s28, 1 }
   0x9   : > { %p1434_p4 = por %p189_p2, %p188_p1  ;;  %s173_s8 = ssub.s32 %s1349_s25, %s1595_s29 }
   0xa   : > { %p994_p6 = scmp.ge.s32.totalorder %s1353_s26, 1  ;;  %p176_p7 = scmp.eq.s32.totalorder %s173_s8, 0 }
   0xb   : > { %p1441_p8 = por %p195_p5, %p194_p3  ;;  %p243_p9 = scmp.lt.s32.totalorder %s1353_s26, 3 }
   0xc   : > { %s1447_s10 = scalar_select %p176_p7, %s1341_s23, %s178_s30  }
   0xd   : > { %p244_p10 = pnand %p994_p6, %p243_p9 }
   0xe   : > { %v312_v0 = vld [vmem:[%s1582_s2] sm:$0xff] (!%p244_p10)  ;;  %v313_v1 = vld [vmem:[%s1582_s2 + $0x8] sm:$0xff] (!%p244_p10)  ;;  %v314_v2 = vld [vmem:[%s1582_s2 + $0x10] sm:$0xff] (!%p244_p10)  ;;  %p280_p11 = scmp.lt.s32.totalorder (!%p244_p10), %s1345_s24, 1  ;;  %vm323_vm0 = vcmask (!%p244_p10), 261120   ;;  %v1355_v14 = vmov (!%p244_p10), 0.0  }
   0xf   : > { %247 = sbr.rel (%p244_p10) target bundleno = 894 (0x37e), region = 44  ;;  %v1177_v3 = vpack.c.bf16 (!%p244_p10), %v313_v1, %v312_v0  ;;  %v315_v4 = vld [vmem:[%s1582_s2 + $0x18] sm:$0xff] (!%p244_p10)  ;;  %v999_v8 = vld [vmem:[%s1583_s3] ss:$0 sm:$0xff] (!%p244_p10)  ;;  %vm1186_vm1 = vmpackc.low (!%p244_p10), %vm323_vm0, %vm323_vm0  ;;  %v1356_v15 = vmov (!%p244_p10), 0.0|0.0   ;;  %vm1357_vm2 = vmmov (!%p244_p10), 0  }
  0x10   : > { %v1181_v5 = vpack.c.bf16 (!%p244_p10), %v315_v4, %v314_v2  ;;  %s277_s16 = sand.u32 (!%p244_p10), 1, %s1337_s22   ;;  %s1023_s28 = sshll.u32 (!%p244_p10), %s1345_s24, 7 }
  0x11   : > { %1178 = vmatprep.subr.bf16.mxu0 (!%p244_p10), %v1177_v3  ;;  %s995_s17 = sshll.u32 (!%p244_p10), %s277_s16, 3  ;;  %s1533_s13 = scalar_lea.hbm (!%p244_p10), %s1586_s6, %s1023_s28 }
  0x12   : > { %1180 = vmatpush3.bf16.msra.mxu0 (!%p244_p10), %v1177_v3  ;;  %s893_s14 = scalar_lea.sflag (!%p244_p10), [#allocation4], %s277_s16 }
  0x13   : > { %1182 = vmatprep.subr.bf16.mxu0 (!%p244_p10), %v1181_v5 }
  0x16   : > { %s1463_s19 = scalar_select %p280_p11, %s1345_s24, 1  ;;  %1184 = vmatpush3.bf16.msra.mxu0 %v1181_v5 }
  0x17   : > { %1191 = vmatprep.subr.bf16.mxu0 %v1356_v15  ;;  %s1358_s24 = smov [#allocation3]  }
  0x18   : > { %s1026_s20 = sshll.u32 %s1463_s19, 7  ;;  %s996_s12 = sshll.u32 %s1463_s19, 3 }
  0x19   : > { %s1469_s30 = scalar_lea.vmem %s1581_s1, %s1026_s20  ;;  %s286_s15 = scalar_lea.vmem %s1580_s0, %s996_s12 }
  0x1a   : > { %v296_v6 = vld [vmem:[%s1469_s30] sm:$0xff]  ;;  %v297_v7 = vld [vmem:[%s1469_s30 + $0x8] sm:$0xff]  ;;  %v298_v16 = vld [vmem:[%s1469_s30 + $0x10] sm:$0xff] }
  0x1b   : > { %1090 = vmatprep.mubr.msk.f32.mxu0 %vm323_vm0, %v296_v6  ;;  %v299_v17 = vld [vmem:[%s1469_s30 + $0x18] sm:$0xff]  ;;  %v300_v18 = vld [vmem:[%s1469_s30 + $0x20] sm:$0xff]  ;;  %v301_v19 = vld [vmem:[%s1469_s30 + $0x28] sm:$0xff] }
  0x1c   : > { %1091 = vmatmul.mubr.msk.f32.vlgmr.msra.gmra.mrb[0].mxu0 %vm323_vm0, %v297_v7  ;;  %v302_v20 = vld [vmem:[%s1469_s30 + $0x30] sm:$0xff]  ;;  %v303_v21 = vld [vmem:[%s1469_s30 + $0x38] sm:$0xff]  ;;  %v304_v22 = vld [vmem:[%s1469_s30 + $0x40] sm:$0xff] }
  0x1d   : > { %1093 = vmatprep.mubr.msk.f32.mxu0 %vm323_vm0, %v298_v16  ;;  %v305_v23 = vld [vmem:[%s1469_s30 + $0x48] sm:$0xff]  ;;  %v306_v24 = vld [vmem:[%s1469_s30 + $0x50] sm:$0xff]  ;;  %v307_v25 = vld [vmem:[%s1469_s30 + $0x58] sm:$0xff] }
  0x1e   : > { %v308_v26 = vld [vmem:[%s1469_s30 + $0x60] sm:$0xff]  ;;  %v309_v27 = vld [vmem:[%s1469_s30 + $0x68] sm:$0xff]  ;;  %v310_v28 = vld [vmem:[%s1469_s30 + $0x70] sm:$0xff] }
  0x1f   : > { %v311_v29 = vld [vmem:[%s1469_s30 + $0x78] sm:$0xff]  ;;  %v775_v54 = vld [vmem:[%s286_s15] sm:$0xff]  ;;  %s279_s30 = scalar_lea.vmem [#allocation3], %s995_s17  ;;  %s1279_s17 = sshll.u32 %s1358_s24, 4  ;;  %s1280_s17 = int_to_ptr.vmem [resolvable:$false] %s1279_s17 }
  0x20   : > { %1094 = vmatmul.mubr.msk.f32.gmra.mrb[2].mxu0 %vm323_vm0, %v299_v17  ;;  %v1020_v17 = vld [vmem:[%s1584_s4] ss:$0 sm:$0xff]  ;;  %s907_s8 = sshll.u32 %s279_s30, 4  ;;  %s1281_s18 = scalar_lea.vmem %s1280_s17, 256  ;;  %s1535_s8 = int_to_ptr.vmem [resolvable:$true] %s907_s8 }
  0x21   : > { %1096 = vmatprep.mubr.msk.f32.mxu0 %vm323_vm0, %v300_v18  ;;  %s1275_s15 = scalar_lea.vmem %s1535_s8, 128  ;;  %p1282_p1 = scmp.lt.s32.totalorder %s1535_s8, %s1280_s17 }
  0x22   : > { %p1276_p12 = scmp.ne.s32.totalorder %s1535_s8, %s1275_s15  ;;  %p1283_p2 = scmp.lt.s32.totalorder %s1281_s18, %s1275_s15 }
  0x24   : > { %1097 = vmatmul.mubr.msk.f32.gmra.mrb[4].mxu0 %vm323_vm0, %v301_v19  ;;  %v1021_v19 = vld [vmem:[%s1585_s5] ss:$0 sm:$0xff]  ;;  %p1277_p13 = pnand %p1276_p12, %p1434_p4  ;;  %p1284_p3 = por %p1283_p2, %p1282_p1 }
  0x25   : > { %1099 = vmatprep.mubr.msk.f32.mxu0 %vm323_vm0, %v302_v20 }
  0x26   : > { %p1278_p0 = pneg %p1277_p13 }
  0x28   : > { %1100 = vmatmul.mubr.msk.f32.gmra.mrb[6].mxu0 %vm323_vm0, %v303_v21  ;;  %p1285_p5 = pnand %p1284_p3, %p1278_p0 }
  0x29   : > { %1102 = vmatprep.mubr.msk.f32.mxu0 %vm323_vm0, %v304_v22 }
  0x2c   : > { %1103 = vmatmul.mubr.msk.f32.gmra.mrb[8].mxu0 %vm323_vm0, %v305_v23 }
  0x2d   : > { %1105 = vmatprep.mubr.msk.f32.mxu0 %vm323_vm0, %v306_v24 }
  0x30   : > { %1106 = vmatmul.mubr.msk.f32.gmra.mrb[10].mxu0 %vm323_vm0, %v307_v25 }
  0x31   : > { %1108 = vmatprep.mubr.msk.f32.mxu0 %vm323_vm0, %v308_v26 }
  0x34   : > { %1109 = vmatmul.mubr.msk.f32.gmra.mrb[12].mxu0 %vm323_vm0, %v309_v27 }
  0x35   : > { %1111 = vmatprep.mubr.msk.f32.mxu0 %vm323_vm0, %v310_v28 }
  0x38   : > { %1112 = vmatmul.mubr.msk.f32.gmra.mrb[14].mxu0 %vm323_vm0, %v311_v29 }
  0x39   : > { %1174 = vmatprep.mubr.msk.f32.mxu0 %vm1357_vm2, %v1355_v14 }
  0xef   : > { %v1092_v9 = vpop.f32.mrb[0].mxu0 }
  0xf0   : > { %v444_v10 = vadd.f32 %v1092_v9, %v999_v8  ;;  %v438_v11 = vpop.f32.mrb[1].mxu0 }
  0xf1   : > { %v439_v12 = vadd.f32 %v999_v8, %v438_v11 }
  0xf3   : > { %1118 = vmatprep.mubr.msk.f32.mxu1 %vm323_vm0, %v439_v12  ;;  %v1185_v13 = vpack.c.bf16 %v444_v10, %v439_v12  ;;  %v1095_v55 = vpop.f32.mrb[2].mxu0 }
  0xf4   : > { %v448_v56 = vpop.f32.mrb[3].mxu0 }
  0xf5   : > { %1187 = vmatprep.subr.msk.bf16.mxu1 %vm1186_vm1, %v1185_v13 }
  0xf6   : > { %1190 = vmatpush3.bf16.xpose.msk.msra.mxu1 %vm1186_vm1, %v1185_v13 }
  0xf7   : > { %v1098_v57 = vpop.f32.mrb[4].mxu0 }
  0xf8   : > { %v458_v58 = vpop.f32.mrb[5].mxu0 }
  0xfb   : > { %v1101_v59 = vpop.f32.mrb[6].mxu0 }
  0xfc   : > { %v468_v60 = vpop.f32.mrb[7].mxu0 }
  0xfd   : > { %1119 = vmatmul.mubr.msk.f32.vlgmr.msra.gmra.mrb[0].mxu1 %vm323_vm0, %v444_v10 }
  0xfe   : > { %1121 = vmatprep.mubr.f32.mxu1 %v1355_v14 }
  0xff   : > { %v1104_v61 = vpop.f32.mrb[8].mxu0 }
 0x100   : > { %v478_v62 = vpop.f32.mrb[9].mxu0 }
 0x101   : > { %1122 = vmatmul.mubr.f32.gmra.mrb[2].mxu1 %v1355_v14 }
 0x102   : > { %1124 = vmatprep.mubr.f32.mxu1 %v1355_v14 }
 0x103   : > { %v1107_v63 = vpop.f32.mrb[10].mxu0 }
 0x104   : > { %v488_v0 = vpop.f32.mrb[11].mxu0 }
 0x105   : > { %1125 = vmatmul.mubr.f32.gmra.mrb[4].mxu1 %v1355_v14 }
 0x106   : > { %1127 = vmatprep.mubr.f32.mxu1 %v1355_v14 }
 0x107   : > { %v1110_v1 = vpop.f32.mrb[12].mxu0 }
 0x108   : > { %v498_v2 = vpop.f32.mrb[13].mxu0 }
 0x109   : > { %1128 = vmatmul.mubr.f32.gmra.mrb[6].mxu1 %v1355_v14 }
 0x10a   : > { %1130 = vmatprep.mubr.f32.mxu1 %v1355_v14 }
 0x10b   : > { %v1113_v3 = vpop.f32.mrb[14].mxu0 }
 0x10c   : > { %v508_v4 = vpop.f32.mrb[15].mxu0 }
 0x10d   : > { %1131 = vmatmul.mubr.f32.gmra.mrb[8].mxu1 %v1355_v14 }
 0x10e   : > { %1133 = vmatprep.mubr.f32.mxu1 %v1355_v14 }
 0x111   : > { %1134 = vmatmul.mubr.f32.gmra.mrb[10].mxu1 %v1355_v14 }
 0x112   : > { %1136 = vmatprep.mubr.f32.mxu1 %v1355_v14 }
 0x115   : > { %1137 = vmatmul.mubr.f32.gmra.mrb[12].mxu1 %v1355_v14 }
 0x116   : > { %1139 = vmatprep.mubr.f32.mxu1 %v1355_v14 }
 0x119   : > { %1140 = vmatmul.mubr.f32.gmra.mrb[14].mxu1 %v1355_v14 }
 0x1d0   : > { %v1120_v30 = vpop.f32.mrb[0].mxu1 }
 0x1d1   : > { %v680_v31 = vpop.f32.mrb[1].mxu1 }
 0x1d2   : > { %v1192_v32 = vpack.c.bf16 %v1120_v30, %v680_v31 }
 0x1d4   : > { %v1123_v33 = vpop.f32.mrb[2].mxu1  ;;  %1193 = vmatpush3.bf16.msra.mxu0 %v1192_v32 }
 0x1d5   : > { %v690_v34 = vpop.f32.mrb[3].mxu1  ;;  %1194 = vmatprep.subr.bf16.mxu0 %v1356_v15 }
 0x1d6   : > { %v1195_v35 = vpack.c.bf16 %v1123_v33, %v690_v34 }
 0x1d8   : > { %v1126_v36 = vpop.f32.mrb[4].mxu1  ;;  %1196 = vmatpush3.bf16.msra.mxu0 %v1195_v35 }
 0x1d9   : > { %v700_v37 = vpop.f32.mrb[5].mxu1  ;;  %1197 = vmatprep.subr.bf16.mxu0 %v1356_v15 }
 0x1da   : > { %v1198_v38 = vpack.c.bf16 %v1126_v36, %v700_v37 }
 0x1dc   : > { %v1129_v39 = vpop.f32.mrb[6].mxu1  ;;  %1199 = vmatpush3.bf16.msra.mxu0 %v1198_v38 }
 0x1dd   : > { %v710_v40 = vpop.f32.mrb[7].mxu1  ;;  %1200 = vmatprep.subr.bf16.mxu0 %v1356_v15 }
 0x1de   : > { %v1201_v41 = vpack.c.bf16 %v1129_v39, %v710_v40 }
 0x1e0   : > { %v1132_v42 = vpop.f32.mrb[8].mxu1  ;;  %1202 = vmatpush3.bf16.msra.mxu0 %v1201_v41 }
 0x1e1   : > { %v720_v43 = vpop.f32.mrb[9].mxu1  ;;  %1203 = vmatprep.subr.bf16.mxu0 %v1356_v15 }
 0x1e2   : > { %v1204_v44 = vpack.c.bf16 %v1132_v42, %v720_v43 }
 0x1e4   : > { %v1135_v45 = vpop.f32.mrb[10].mxu1  ;;  %1205 = vmatpush3.bf16.msra.mxu0 %v1204_v44 }
 0x1e5   : > { %v730_v46 = vpop.f32.mrb[11].mxu1  ;;  %1206 = vmatprep.subr.bf16.mxu0 %v1356_v15 }
 0x1e6   : > { %v1207_v47 = vpack.c.bf16 %v1135_v45, %v730_v46 }
 0x1e8   : > { %v1138_v48 = vpop.f32.mrb[12].mxu1  ;;  %1208 = vmatpush3.bf16.msra.mxu0 %v1207_v47 }
 0x1e9   : > { %v740_v49 = vpop.f32.mrb[13].mxu1  ;;  %1209 = vmatprep.subr.bf16.mxu0 %v1356_v15 }
 0x1ea   : > { %v1210_v50 = vpack.c.bf16 %v1138_v48, %v740_v49 }
 0x1ec   : > { %v1141_v51 = vpop.f32.mrb[14].mxu1  ;;  %1211 = vmatpush3.bf16.msra.mxu0 %v1210_v50 }
 0x1ed   : > { %v750_v52 = vpop.f32.mrb[15].mxu1  ;;  %1212 = vmatprep.subr.bf16.mxu0 %v1356_v15 }
 0x1ee   : > { %v1213_v53 = vpack.c.bf16 %v1141_v51, %v750_v52 }
 0x1f0   : > { %1214 = vmatpush3.bf16.msra.mxu0 %v1213_v53 }
 0x1f3   : > { %1175 = vmatmul.mubr.f32.vlgmr.msra.gmra.mrb[16].mxu0 %v775_v54 }
 0x2c6   : > { %v858_v5 = vpop.f32.mrb[16].mxu0 }
 0x2c7   : > { %862 = vadd.xlane.f32.xlu0 %v858_v5  ;;  %v1176_v6 = vpop.f32.mrb[17].mxu0  ;;  %v865_v7 = vmul.f32 %v858_v5, %v858_v5 }
 0x2cb   : > { %866 = vadd.xlane.f32.xlu0 %v865_v7 }
 0x354   : > { %v863_v8 = vpop.xlane.xlu0 %862 }
 0x355   : > { %v864_v9 = vmul.f32 0.0625, %v863_v8 }
 0x357   : > { %v869_v11 = vmul.f32 %v864_v9, %v864_v9  ;;  %v871_v15 = vsub.f32 %v858_v5, %v864_v9 }
 0x358   : > { %v867_v10 = vpop.xlane.xlu0 %866 }
 0x359   : > { %v868_v12 = vmul.f32 0.0625, %v867_v10 }
 0x35b   : > { %v870_v13 = vsub.f32 %v868_v12, %v869_v11 }
 0x35d   : > { %v872_v14 = vadd.f32 1.6e-05, %v870_v13 }
 0x35f   : > { %1273 = vrsqrt.f32 %v872_v14 }
 0x369   : > { %v1274_v16 = vpop.eup %1273 }
 0x36a   : > { %v874_v18 = vmul.f32 %v1274_v16, %v871_v15 }
 0x36c   : > { %v882_v20 = vmul.f32 %v1020_v17, %v874_v18 }
 0x36e   : > { %v890_v21 = vadd.f32 %v1021_v19, %v882_v20 }
 0x370   : > { %891 = vst [vmem:[%s279_s30] sm:$0xff] %v890_v21 }
 0x371   : > { %1288 = shalt.err (!%p1285_p5)
}
 0x372   : > { %s1289_s16 = scalar_lea.hbm %s1533_s13, 128  ;;  %s1293_s27 = scalar_lea.hbm %s1586_s6, 256 }
 0x373   : > { %p1290_p6 = scmp.ne.s32.totalorder %s1533_s13, %s1289_s16  ;;  %p1294_p10 = scmp.lt.u32.totalorder %s1533_s13, %s1586_s6 }
 0x374   : > { %p1295_p11 = scmp.lt.u32.totalorder %s1293_s27, %s1289_s16  ;;  %p1297_p13 = scmp.lt.u32.totalorder %s1289_s16, %s1533_s13 }
 0x375   : > { %p1291_p7 = pnand %p1290_p6, %p1434_p4 }
 0x376   : > { %p1296_p12 = por %p1295_p11, %p1294_p10 }
 0x377   : > { %p1292_p9 = pneg %p1291_p7 }
 0x378   : > { %p1298_p0 = por %p1297_p13, %p1296_p12 }
 0x37a   : > { %p1299_p1 = pnand %p1298_p0, %p1292_p9 }
 0x37c   : > { %1302 = shalt.err (!%p1299_p1)
}
 0x37d   : > { %1215 = dma.vmem_to_hbm [thread:$0]  (%p1434_p4), %s1535_s8, 128, %s1533_s13, %s893_s14  }
 0x37e PF: > { %p1221_p2 = scmp.ge.s32.totalorder %s1353_s26, 2  ;;  %s919_s11 = sand.u32 1, %s1333_s21  }
 0x37f   : > { %s920_s12 = scalar_lea.sflag [#allocation4], %s919_s11 }
 0x380   : > { %p1218_p3 = pnand %p1221_p2, %p1441_p8 }
 0x382   : > { %1328 = dma.done.wait (!%p1218_p3), %s920_s12, 128  }
 0x383   : > { %1330 = vsyncadd (!%p1218_p3), %s920_s12, 4294967168  ;;  %s19_s26 = sadd.s32 1, %s1353_s26   ;;  %s1589_s21 = smov %s1337_s22 }
 0x384   : > { %p16_p5 = scmp.ge.s32.totalorder %s19_s26, 4   ;;  %s1590_s22 = smov %s1341_s23 }
 0x385   : > { %s1591_s23 = smov %s1447_s10  ;;  %s1592_s24 = smov %s1349_s25 }
 0x386   : > { %s1593_s25 = smov %s1595_s29  ;;  %18 = sbr.rel (!%p16_p5) target bundleno = 4 (0x4), region = 86 }
 0x38d   :  { %925 = vsyncpa [#allocation4], 1 }
 0x38e   :  { %927 = vsyncpa [#allocation4 + $0x1], 1 }

// kernel: tpu_custom_call.1
= control target key start
LH: loop header
LB: loop body
LE: loop exit
PB: predicated region body
PF: predicated region fallthrough
CT: control target
= control target key end

     0   :  { %11 = vsyncpa [#allocation4], 0  ;;  %s1580_s0 = inlined_call_operand.vmem [shape: f32[2,8,128], index: 0, kind: input, shape index: {}]   ;;  %s1581_s1 = inlined_call_operand.vmem [shape: f32[2,128,32], index: 1, kind: input, shape index: {}]   ;;  %s1582_s2 = inlined_call_operand.vmem [shape: f32[32,32], index: 2, kind: input, shape index: {}]   ;;  %s1583_s3 = inlined_call_operand.vmem [shape: f32[1,32], index: 3, kind: input, shape index: {}]   ;;  %s1584_s4 = inlined_call_operand.vmem [shape: f32[1,128], index: 4, kind: input, shape index: {}]   ;;  %s1585_s5 = inlined_call_operand.vmem [shape: f32[1,128], index: 5, kind: input, shape index: {}]   ;;  %s1586_s6 = inlined_call_operand.hbm [shape: f32[2,8,128], index: 6, kind: output, shape index: {}]  }
   0x1   :  { %13 = vsyncpa [#allocation4 + $0x1], 0  ;;  %s1394_s21 = smov 0   ;;  %s1396_s22 = smov 0  }
   0x2   :  { %s1398_s23 = smov 0   ;;  %s1400_s24 = smov 0  }
   0x3   :  { %s1402_s25 = smov 0   ;;  %s1404_s26 = smov 0  }
   0x4 LB: > { %s990_s27 = sadd.s32 4294967295, %s1353_s26   ;;  %s991_s28 = sadd.s32 4294967294, %s1353_s26   ;;  %s1353_s26 = sphi %s1404_s26, %s19_s26   ;;  %s1349_s25 = sphi %s1402_s25, %s1593_s25   ;;  %s1345_s24 = sphi %s1400_s24, %s1592_s24   ;;  %s1341_s23 = sphi %s1398_s23, %s1591_s23   ;;  %s1337_s22 = sphi %s1396_s22, %s1590_s22   ;;  %s1333_s21 = sphi %s1394_s21, %s1589_s21  }
   0x5   : > { %s31_s29 = sadd.s32 1, %s1349_s25  ;;  %s178_s30 = sadd.s32 1, %s1341_s23 }
   0x6   : > { %p33_p0 = scmp.ge.s32.totalorder %s31_s29, 2  ;;  %p188_p1 = scmp.ne.s32.totalorder %s1341_s23, %s1337_s22 }
   0x7   : > { %p189_p2 = scmp.eq.s32.totalorder %s990_s27, 1  ;;  %p194_p3 = scmp.ne.s32.totalorder %s1337_s22, %s1333_s21 }
   0x8   : > { %s1595_s29 = smov (%p33_p0, %s31_s29), 0  ;;  %p195_p5 = scmp.eq.s32.totalorder %s991_s28, 1 }
   0x9   : > { %p1434_p4 = por %p189_p2, %p188_p1  ;;  %s173_s8 = ssub.s32 %s1349_s25, %s1595_s29 }
   0xa   : > { %p994_p6 = scmp.ge.s32.totalorder %s1353_s26, 1  ;;  %p176_p7 = scmp.eq.s32.totalorder %s173_s8, 0 }
   0xb   : > { %p1441_p8 = por %p195_p5, %p194_p3  ;;  %p243_p9 = scmp.lt.s32.totalorder %s1353_s26, 3 }
   0xc   : > { %s1447_s10 = scalar_select %p176_p7, %s1341_s23, %s178_s30  }
   0xd   : > { %p244_p10 = pnand %p994_p6, %p243_p9 }
   0xe   : > { %v312_v0 = vld [vmem:[%s1582_s2] sm:$0xff] (!%p244_p10)  ;;  %v313_v1 = vld [vmem:[%s1582_s2 + $0x8] sm:$0xff] (!%p244_p10)  ;;  %v314_v2 = vld [vmem:[%s1582_s2 + $0x10] sm:$0xff] (!%p244_p10)  ;;  %p280_p11 = scmp.lt.s32.totalorder (!%p244_p10), %s1345_s24, 1  ;;  %vm323_vm0 = vcmask (!%p244_p10), 261120   ;;  %v1355_v14 = vmov (!%p244_p10), 0.0  }
   0xf   : > { %247 = sbr.rel (%p244_p10) target bundleno = 894 (0x37e), region = 44  ;;  %v1177_v3 = vpack.c.bf16 (!%p244_p10), %v313_v1, %v312_v0  ;;  %v315_v4 = vld [vmem:[%s1582_s2 + $0x18] sm:$0xff] (!%p244_p10)  ;;  %v999_v8 = vld [vmem:[%s1583_s3] ss:$0 sm:$0xff] (!%p244_p10)  ;;  %vm1186_vm1 = vmpackc.low (!%p244_p10), %vm323_vm0, %vm323_vm0  ;;  %v1356_v15 = vmov (!%p244_p10), 0.0|0.0   ;;  %vm1357_vm2 = vmmov (!%p244_p10), 0  }
  0x10   : > { %v1181_v5 = vpack.c.bf16 (!%p244_p10), %v315_v4, %v314_v2  ;;  %s277_s16 = sand.u32 (!%p244_p10), 1, %s1337_s22   ;;  %s1023_s28 = sshll.u32 (!%p244_p10), %s1345_s24, 7 }
  0x11   : > { %1178 = vmatprep.subr.bf16.mxu0 (!%p244_p10), %v1177_v3  ;;  %s995_s17 = sshll.u32 (!%p244_p10), %s277_s16, 3  ;;  %s1533_s13 = scalar_lea.hbm (!%p244_p10), %s1586_s6, %s1023_s28 }
  0x12   : > { %1180 = vmatpush3.bf16.msra.mxu0 (!%p244_p10), %v1177_v3  ;;  %s893_s14 = scalar_lea.sflag (!%p244_p10), [#allocation4], %s277_s16 }
  0x13   : > { %1182 = vmatprep.subr.bf16.mxu0 (!%p244_p10), %v1181_v5 }
  0x16   : > { %s1463_s19 = scalar_select %p280_p11, %s1345_s24, 1  ;;  %1184 = vmatpush3.bf16.msra.mxu0 %v1181_v5 }
  0x17   : > { %1191 = vmatprep.subr.bf16.mxu0 %v1356_v15  ;;  %s1358_s24 = smov [#allocation3]  }
  0x18   : > { %s1026_s20 = sshll.u32 %s1463_s19, 7  ;;  %s996_s12 = sshll.u32 %s1463_s19, 3 }
  0x19   : > { %s1469_s30 = scalar_lea.vmem %s1581_s1, %s1026_s20  ;;  %s286_s15 = scalar_lea.vmem %s1580_s0, %s996_s12 }
  0x1a   : > { %v296_v6 = vld [vmem:[%s1469_s30] sm:$0xff]  ;;  %v297_v7 = vld [vmem:[%s1469_s30 + $0x8] sm:$0xff]  ;;  %v298_v16 = vld [vmem:[%s1469_s30 + $0x10] sm:$0xff] }
  0x1b   : > { %1090 = vmatprep.mubr.msk.f32.mxu0 %vm323_vm0, %v296_v6  ;;  %v299_v17 = vld [vmem:[%s1469_s30 + $0x18] sm:$0xff]  ;;  %v300_v18 = vld [vmem:[%s1469_s30 + $0x20] sm:$0xff]  ;;  %v301_v19 = vld [vmem:[%s1469_s30 + $0x28] sm:$0xff] }
  0x1c   : > { %1091 = vmatmul.mubr.msk.f32.vlgmr.msra.gmra.mrb[0].mxu0 %vm323_vm0, %v297_v7  ;;  %v302_v20 = vld [vmem:[%s1469_s30 + $0x30] sm:$0xff]  ;;  %v303_v21 = vld [vmem:[%s1469_s30 + $0x38] sm:$0xff]  ;;  %v304_v22 = vld [vmem:[%s1469_s30 + $0x40] sm:$0xff] }
  0x1d   : > { %1093 = vmatprep.mubr.msk.f32.mxu0 %vm323_vm0, %v298_v16  ;;  %v305_v23 = vld [vmem:[%s1469_s30 + $0x48] sm:$0xff]  ;;  %v306_v24 = vld [vmem:[%s1469_s30 + $0x50] sm:$0xff]  ;;  %v307_v25 = vld [vmem:[%s1469_s30 + $0x58] sm:$0xff] }
  0x1e   : > { %v308_v26 = vld [vmem:[%s1469_s30 + $0x60] sm:$0xff]  ;;  %v309_v27 = vld [vmem:[%s1469_s30 + $0x68] sm:$0xff]  ;;  %v310_v28 = vld [vmem:[%s1469_s30 + $0x70] sm:$0xff] }
  0x1f   : > { %v311_v29 = vld [vmem:[%s1469_s30 + $0x78] sm:$0xff]  ;;  %v775_v54 = vld [vmem:[%s286_s15] sm:$0xff]  ;;  %s279_s30 = scalar_lea.vmem [#allocation3], %s995_s17  ;;  %s1279_s17 = sshll.u32 %s1358_s24, 4  ;;  %s1280_s17 = int_to_ptr.vmem [resolvable:$false] %s1279_s17 }
  0x20   : > { %1094 = vmatmul.mubr.msk.f32.gmra.mrb[2].mxu0 %vm323_vm0, %v299_v17  ;;  %v1020_v17 = vld [vmem:[%s1584_s4] ss:$0 sm:$0xff]  ;;  %s907_s8 = sshll.u32 %s279_s30, 4  ;;  %s1281_s18 = scalar_lea.vmem %s1280_s17, 256  ;;  %s1535_s8 = int_to_ptr.vmem [resolvable:$true] %s907_s8 }
  0x21   : > { %1096 = vmatprep.mubr.msk.f32.mxu0 %vm323_vm0, %v300_v18  ;;  %s1275_s15 = scalar_lea.vmem %s1535_s8, 128  ;;  %p1282_p1 = scmp.lt.s32.totalorder %s1535_s8, %s1280_s17 }
  0x22   : > { %p1276_p12 = scmp.ne.s32.totalorder %s1535_s8, %s1275_s15  ;;  %p1283_p2 = scmp.lt.s32.totalorder %s1281_s18, %s1275_s15 }
  0x24   : > { %1097 = vmatmul.mubr.msk.f32.gmra.mrb[4].mxu0 %vm323_vm0, %v301_v19  ;;  %v1021_v19 = vld [vmem:[%s1585_s5] ss:$0 sm:$0xff]  ;;  %p1277_p13 = pnand %p1276_p12, %p1434_p4  ;;  %p1284_p3 = por %p1283_p2, %p1282_p1 }
  0x25   : > { %1099 = vmatprep.mubr.msk.f32.mxu0 %vm323_vm0, %v302_v20 }
  0x26   : > { %p1278_p0 = pneg %p1277_p13 }
  0x28   : > { %1100 = vmatmul.mubr.msk.f32.gmra.mrb[6].mxu0 %vm323_vm0, %v303_v21  ;;  %p1285_p5 = pnand %p1284_p3, %p1278_p0 }
  0x29   : > { %1102 = vmatprep.mubr.msk.f32.mxu0 %vm323_vm0, %v304_v22 }
  0x2c   : > { %1103 = vmatmul.mubr.msk.f32.gmra.mrb[8].mxu0 %vm323_vm0, %v305_v23 }
  0x2d   : > { %1105 = vmatprep.mubr.msk.f32.mxu0 %vm323_vm0, %v306_v24 }
  0x30   : > { %1106 = vmatmul.mubr.msk.f32.gmra.mrb[10].mxu0 %vm323_vm0, %v307_v25 }
  0x31   : > { %1108 = vmatprep.mubr.msk.f32.mxu0 %vm323_vm0, %v308_v26 }
  0x34   : > { %1109 = vmatmul.mubr.msk.f32.gmra.mrb[12].mxu0 %vm323_vm0, %v309_v27 }
  0x35   : > { %1111 = vmatprep.mubr.msk.f32.mxu0 %vm323_vm0, %v310_v28 }
  0x38   : > { %1112 = vmatmul.mubr.msk.f32.gmra.mrb[14].mxu0 %vm323_vm0, %v311_v29 }
  0x39   : > { %1174 = vmatprep.mubr.msk.f32.mxu0 %vm1357_vm2, %v1355_v14 }
  0xef   : > { %v1092_v9 = vpop.f32.mrb[0].mxu0 }
  0xf0   : > { %v444_v10 = vadd.f32 %v1092_v9, %v999_v8  ;;  %v438_v11 = vpop.f32.mrb[1].mxu0 }
  0xf1   : > { %v439_v12 = vadd.f32 %v999_v8, %v438_v11 }
  0xf3   : > { %1118 = vmatprep.mubr.msk.f32.mxu1 %vm323_vm0, %v439_v12  ;;  %v1185_v13 = vpack.c.bf16 %v444_v10, %v439_v12  ;;  %v1095_v55 = vpop.f32.mrb[2].mxu0 }
  0xf4   : > { %v448_v56 = vpop.f32.mrb[3].mxu0 }
  0xf5   : > { %1187 = vmatprep.subr.msk.bf16.mxu1 %vm1186_vm1, %v1185_v13 }
  0xf6   : > { %1190 = vmatpush3.bf16.xpose.msk.msra.mxu1 %vm1186_vm1, %v1185_v13 }
  0xf7   : > { %v1098_v57 = vpop.f32.mrb[4].mxu0 }
  0xf8   : > { %v458_v58 = vpop.f32.mrb[5].mxu0 }
  0xfb   : > { %v1101_v59 = vpop.f32.mrb[6].mxu0 }
  0xfc   : > { %v468_v60 = vpop.f32.mrb[7].mxu0 }
  0xfd   : > { %1119 = vmatmul.mubr.msk.f32.vlgmr.msra.gmra.mrb[0].mxu1 %vm323_vm0, %v444_v10 }
  0xfe   : > { %1121 = vmatprep.mubr.f32.mxu1 %v1355_v14 }
  0xff   : > { %v1104_v61 = vpop.f32.mrb[8].mxu0 }
 0x100   : > { %v478_v62 = vpop.f32.mrb[9].mxu0 }
 0x101   : > { %1122 = vmatmul.mubr.f32.gmra.mrb[2].mxu1 %v1355_v14 }
 0x102   : > { %1124 = vmatprep.mubr.f32.mxu1 %v1355_v14 }
 0x103   : > { %v1107_v63 = vpop.f32.mrb[10].mxu0 }
 0x104   : > { %v488_v0 = vpop.f32.mrb[11].mxu0 }
 0x105   : > { %1125 = vmatmul.mubr.f32.gmra.mrb[4].mxu1 %v1355_v14 }
 0x106   : > { %1127 = vmatprep.mubr.f32.mxu1 %v1355_v14 }
 0x107   : > { %v1110_v1 = vpop.f32.mrb[12].mxu0 }
 0x108   : > { %v498_v2 = vpop.f32.mrb[13].mxu0 }
 0x109   : > { %1128 = vmatmul.mubr.f32.gmra.mrb[6].mxu1 %v1355_v14 }
 0x10a   : > { %1130 = vmatprep.mubr.f32.mxu1 %v1355_v14 }
 0x10b   : > { %v1113_v3 = vpop.f32.mrb[14].mxu0 }
 0x10c   : > { %v508_v4 = vpop.f32.mrb[15].mxu0 }
 0x10d   : > { %1131 = vmatmul.mubr.f32.gmra.mrb[8].mxu1 %v1355_v14 }
 0x10e   : > { %1133 = vmatprep.mubr.f32.mxu1 %v1355_v14 }
 0x111   : > { %1134 = vmatmul.mubr.f32.gmra.mrb[10].mxu1 %v1355_v14 }
 0x112   : > { %1136 = vmatprep.mubr.f32.mxu1 %v1355_v14 }
 0x115   : > { %1137 = vmatmul.mubr.f32.gmra.mrb[12].mxu1 %v1355_v14 }
 0x116   : > { %1139 = vmatprep.mubr.f32.mxu1 %v1355_v14 }
 0x119   : > { %1140 = vmatmul.mubr.f32.gmra.mrb[14].mxu1 %v1355_v14 }
 0x1d0   : > { %v1120_v30 = vpop.f32.mrb[0].mxu1 }
 0x1d1   : > { %v680_v31 = vpop.f32.mrb[1].mxu1 }
 0x1d2   : > { %v1192_v32 = vpack.c.bf16 %v1120_v30, %v680_v31 }
 0x1d4   : > { %v1123_v33 = vpop.f32.mrb[2].mxu1  ;;  %1193 = vmatpush3.bf16.msra.mxu0 %v1192_v32 }
 0x1d5   : > { %v690_v34 = vpop.f32.mrb[3].mxu1  ;;  %1194 = vmatprep.subr.bf16.mxu0 %v1356_v15 }
 0x1d6   : > { %v1195_v35 = vpack.c.bf16 %v1123_v33, %v690_v34 }
 0x1d8   : > { %v1126_v36 = vpop.f32.mrb[4].mxu1  ;;  %1196 = vmatpush3.bf16.msra.mxu0 %v1195_v35 }
 0x1d9   : > { %v700_v37 = vpop.f32.mrb[5].mxu1  ;;  %1197 = vmatprep.subr.bf16.mxu0 %v1356_v15 }
 0x1da   : > { %v1198_v38 = vpack.c.bf16 %v1126_v36, %v700_v37 }
 0x1dc   : > { %v1129_v39 = vpop.f32.mrb[6].mxu1  ;;  %1199 = vmatpush3.bf16.msra.mxu0 %v1198_v38 }
 0x1dd   : > { %v710_v40 = vpop.f32.mrb[7].mxu1  ;;  %1200 = vmatprep.subr.bf16.mxu0 %v1356_v15 }
 0x1de   : > { %v1201_v41 = vpack.c.bf16 %v1129_v39, %v710_v40 }
 0x1e0   : > { %v1132_v42 = vpop.f32.mrb[8].mxu1  ;;  %1202 = vmatpush3.bf16.msra.mxu0 %v1201_v41 }
 0x1e1   : > { %v720_v43 = vpop.f32.mrb[9].mxu1  ;;  %1203 = vmatprep.subr.bf16.mxu0 %v1356_v15 }
 0x1e2   : > { %v1204_v44 = vpack.c.bf16 %v1132_v42, %v720_v43 }
 0x1e4   : > { %v1135_v45 = vpop.f32.mrb[10].mxu1  ;;  %1205 = vmatpush3.bf16.msra.mxu0 %v1204_v44 }
 0x1e5   : > { %v730_v46 = vpop.f32.mrb[11].mxu1  ;;  %1206 = vmatprep.subr.bf16.mxu0 %v1356_v15 }
 0x1e6   : > { %v1207_v47 = vpack.c.bf16 %v1135_v45, %v730_v46 }
 0x1e8   : > { %v1138_v48 = vpop.f32.mrb[12].mxu1  ;;  %1208 = vmatpush3.bf16.msra.mxu0 %v1207_v47 }
 0x1e9   : > { %v740_v49 = vpop.f32.mrb[13].mxu1  ;;  %1209 = vmatprep.subr.bf16.mxu0 %v1356_v15 }
 0x1ea   : > { %v1210_v50 = vpack.c.bf16 %v1138_v48, %v740_v49 }
 0x1ec   : > { %v1141_v51 = vpop.f32.mrb[14].mxu1  ;;  %1211 = vmatpush3.bf16.msra.mxu0 %v1210_v50 }
 0x1ed   : > { %v750_v52 = vpop.f32.mrb[15].mxu1  ;;  %1212 = vmatprep.subr.bf16.mxu0 %v1356_v15 }
 0x1ee   : > { %v1213_v53 = vpack.c.bf16 %v1141_v51, %v750_v52 }
 0x1f0   : > { %1214 = vmatpush3.bf16.msra.mxu0 %v1213_v53 }
 0x1f3   : > { %1175 = vmatmul.mubr.f32.vlgmr.msra.gmra.mrb[16].mxu0 %v775_v54 }
 0x2c6   : > { %v858_v5 = vpop.f32.mrb[16].mxu0 }
 0x2c7   : > { %862 = vadd.xlane.f32.xlu0 %v858_v5  ;;  %v1176_v6 = vpop.f32.mrb[17].mxu0  ;;  %v865_v7 = vmul.f32 %v858_v5, %v858_v5 }
 0x2cb   : > { %866 = vadd.xlane.f32.xlu0 %v865_v7 }
 0x354   : > { %v863_v8 = vpop.xlane.xlu0 %862 }
 0x355   : > { %v864_v9 = vmul.f32 0.0625, %v863_v8 }
 0x357   : > { %v869_v11 = vmul.f32 %v864_v9, %v864_v9  ;;  %v871_v15 = vsub.f32 %v858_v5, %v864_v9 }
 0x358   : > { %v867_v10 = vpop.xlane.xlu0 %866 }
 0x359   : > { %v868_v12 = vmul.f32 0.0625, %v867_v10 }
 0x35b   : > { %v870_v13 = vsub.f32 %v868_v12, %v869_v11 }
 0x35d   : > { %v872_v14 = vadd.f32 1.6e-05, %v870_v13 }
 0x35f   : > { %1273 = vrsqrt.f32 %v872_v14 }
 0x369   : > { %v1274_v16 = vpop.eup %1273 }
 0x36a   : > { %v874_v18 = vmul.f32 %v1274_v16, %v871_v15 }
 0x36c   : > { %v882_v20 = vmul.f32 %v1020_v17, %v874_v18 }
 0x36e   : > { %v890_v21 = vadd.f32 %v1021_v19, %v882_v20 }
 0x370   : > { %891 = vst [vmem:[%s279_s30] sm:$0xff] %v890_v21 }
 0x371   : > { %1288 = shalt.err (!%p1285_p5)
}
 0x372   : > { %s1289_s16 = scalar_lea.hbm %s1533_s13, 128  ;;  %s1293_s27 = scalar_lea.hbm %s1586_s6, 256 }
 0x373   : > { %p1290_p6 = scmp.ne.s32.totalorder %s1533_s13, %s1289_s16  ;;  %p1294_p10 = scmp.lt.u32.totalorder %s1533_s13, %s1586_s6 }
 0x374   : > { %p1295_p11 = scmp.lt.u32.totalorder %s1293_s27, %s1289_s16  ;;  %p1297_p13 = scmp.lt.u32.totalorder %s1289_s16, %s1533_s13 }
 0x375   : > { %p1291_p7 = pnand %p1290_p6, %p1434_p4 }
 0x376   : > { %p1296_p12 = por %p1295_p11, %p1294_p10 }
 0x377   : > { %p1292_p9 = pneg %p1291_p7 }
 0x378   : > { %p1298_p0 = por %p1297_p13, %p1296_p12 }
 0x37a   : > { %p1299_p1 = pnand %p1298_p0, %p1292_p9 }
 0x37c   : > { %1302 = shalt.err (!%p1299_p1)
}
 0x37d   : > { %1215 = dma.vmem_to_hbm [thread:$0]  (%p1434_p4), %s1535_s8, 128, %s1533_s13, %s893_s14  }
 0x37e PF: > { %p1221_p2 = scmp.ge.s32.totalorder %s1353_s26, 2  ;;  %s919_s11 = sand.u32 1, %s1333_s21  }
 0x37f   : > { %s920_s12 = scalar_lea.sflag [#allocation4], %s919_s11 }
 0x380   : > { %p1218_p3 = pnand %p1221_p2, %p1441_p8 }
 0x382   : > { %1328 = dma.done.wait (!%p1218_p3), %s920_s12, 128  }
 0x383   : > { %1330 = vsyncadd (!%p1218_p3), %s920_s12, 4294967168  ;;  %s19_s26 = sadd.s32 1, %s1353_s26   ;;  %s1589_s21 = smov %s1337_s22 }
 0x384   : > { %p16_p5 = scmp.ge.s32.totalorder %s19_s26, 4   ;;  %s1590_s22 = smov %s1341_s23 }
 0x385   : > { %s1591_s23 = smov %s1447_s10  ;;  %s1592_s24 = smov %s1349_s25 }
 0x386   : > { %s1593_s25 = smov %s1595_s29  ;;  %18 = sbr.rel (!%p16_p5) target bundleno = 4 (0x4), region = 86 }
 0x38d   :  { %925 = vsyncpa [#allocation4], 1 }
 0x38e   :  { %927 = vsyncpa [#allocation4 + $0x1], 1 }

</bundles_post_ra>
